<compile_context>
chip_gen: v6e
topology: v6e:2x2x1
jax: 0.10.0
libtpu: 0.0.40
codegen_flags: <defaults>
</compile_context>

<pallas_src>
import functools

import jax
import jax.numpy as jnp
from jax.experimental import pallas as pl
from jax.experimental.pallas import tpu as pltpu


def _round_up(x: int, m: int) -> int:
    return (x + m - 1) // m * m


def _dqn_kernel(x_ref, w1_ref, b1_ref, w2_ref, b2_ref, w3_ref, b3_ref, o_ref):
    # x arrives in f32; cast to bf16 for the MXU (f32 accumulation).
    x = x_ref[...].astype(jnp.bfloat16)
    # Layer 1: Linear + bias + ReLU (epilogue in f32 on the VPU).
    h = jnp.dot(x, w1_ref[...], preferred_element_type=jnp.float32)
    h = jnp.maximum(h + b1_ref[...], 0.0)
    # Layer 2: Linear + bias + ReLU.
    h = jnp.dot(h.astype(jnp.bfloat16), w2_ref[...],
                preferred_element_type=jnp.float32)
    h = jnp.maximum(h + b2_ref[...], 0.0)
    # Layer 3: Linear (no activation).  Output block is (tb, n_act); the store
    # is narrow but the HBM writeback is only n_act*4 bytes/row of real data.
    out = jnp.dot(h.astype(jnp.bfloat16), w3_ref[...],
                  preferred_element_type=jnp.float32)
    o_ref[...] = (out + b3_ref[...]).astype(o_ref.dtype)


def prepare_dqn_params(w1, b1, w2, b2, w3, b3):
    """One-time parameter prep (do NOT call per forward pass).

    Weights -> bf16 for the MXU, biases -> f32 row vectors for the epilogue.
    Weight layout is (in, out) so the kernel computes x @ W.
    """
    return (w1.astype(jnp.bfloat16), b1.astype(jnp.float32).reshape(1, -1),
            w2.astype(jnp.bfloat16), b2.astype(jnp.float32).reshape(1, -1),
            w3.astype(jnp.bfloat16), b3.astype(jnp.float32).reshape(1, -1))


@functools.partial(jax.jit, static_argnames=("block_b",))
def dqn_forward(x, w1b, b1f, w2b, b2f, w3b, b3f, *, block_b=2048):
    """Fused DQN forward pass.

    Args:
      x:   (B, n_obs) float32
      w1b: (n_obs, 128) bf16, b1f: (1, 128) f32
      w2b: (128, 128)   bf16, b2f: (1, 128) f32
      w3b: (128, n_act) bf16, b3f: (1, n_act) f32
      (use prepare_dqn_params() once to build these from f32 params)
    Returns:
      (B, n_act) float32 Q-values.
    """
    B, n_obs = x.shape
    n_act = w3b.shape[1]

    # Batch tile: multiple of 8 sublanes, at most block_b rows, and no larger
    # than ceil(B/2) (rounded to 8) so that batches > 8 rows always produce
    # >= 2 grid steps (both v7x TensorCores get work).
    half = _round_up(max((B + 1) // 2, 1), 8)
    tb = max(8, min(_round_up(block_b, 8), half))
    grid = (pl.cdiv(B, tb),)

    # Weights/biases: same block every grid step -> stay resident in VMEM.
    def resident(a):
        return pl.BlockSpec(a.shape, lambda i: (0, 0))

    return pl.pallas_call(
        _dqn_kernel,
        out_shape=jax.ShapeDtypeStruct((B, n_act), jnp.float32),
        grid=grid,
        in_specs=[
            pl.BlockSpec((tb, n_obs), lambda i: (i, 0)),   # x: tiled over batch
            resident(w1b), resident(b1f),
            resident(w2b), resident(b2f),
            resident(w3b), resident(b3f),
        ],
        out_specs=pl.BlockSpec((tb, n_act), lambda i: (i, 0)),
        compiler_params=pltpu.CompilerParams(
            dimension_semantics=("parallel",),  # batch steps shard across TCs
        ),
    )(x, w1b, b1f, w2b, b2f, w3b, b3f)


def init_linear_params(key, in_features, out_features):
    """PyTorch-style init: U(-1/sqrt(in), 1/sqrt(in)).

    Weight is returned pre-transposed to (in, out) for x @ W; bias is (1, out).
    """
    kw, kb = jax.random.split(key)
    bound = 1.0 / jnp.sqrt(jnp.float32(in_features))
    w = jax.random.uniform(kw, (in_features, out_features), jnp.float32,
                           minval=-bound, maxval=bound)
    b = jax.random.uniform(kb, (1, out_features), jnp.float32,
                           minval=-bound, maxval=bound)
    return w, b


def dqn_reference_f32(x, w1, b1, w2, b2, w3, b3):
    h = jax.nn.relu(x @ w1 + b1)
    h = jax.nn.relu(h @ w2 + b2)
    return h @ w3 + b3


def dqn_reference_bf16(x, w1, b1, w2, b2, w3, b3):
    """Reference that mirrors the kernel's bf16-matmul / f32-epilogue math."""
    bf16, f32 = jnp.bfloat16, jnp.float32
    h = jnp.dot(x.astype(bf16), w1.astype(bf16), preferred_element_type=f32) + b1
    h = jnp.maximum(h, 0.0)
    h = jnp.dot(h.astype(bf16), w2.astype(bf16), preferred_element_type=f32) + b2
    h = jnp.maximum(h, 0.0)
    return jnp.dot(h.astype(bf16), w3.astype(bf16), preferred_element_type=f32) + b3


if __name__ == "__main__":
    n_observations = 8
    n_actions = 4
    batch = 2          # tiny online act() case
    hidden = 128       # fixed by the DQN module definition

    key = jax.random.PRNGKey(0)
    kx, k1, k2, k3 = jax.random.split(key, 4)

    x = jax.random.normal(kx, (batch, n_observations), jnp.float32)
    w1, b1 = init_linear_params(k1, n_observations, hidden)
    w2, b2 = init_linear_params(k2, hidden, hidden)
    w3, b3 = init_linear_params(k3, hidden, n_actions)

    params = prepare_dqn_params(w1, b1, w2, b2, w3, b3)

    out = dqn_forward(x, *params)
    jax.block_until_ready(out)
    assert out.shape == (batch, n_actions)

    # Tight check vs a reference using the same bf16/f32 mixed precision.
    ref_bf16 = dqn_reference_bf16(x, w1, b1, w2, b2, w3, b3)
    assert jnp.allclose(out, ref_bf16, atol=1e-3, rtol=1e-3), "mismatch vs bf16 ref"

    # Loose check vs the pure-f32 PyTorch-equivalent reference.
    ref_f32 = dqn_reference_f32(x, w1, b1, w2, b2, w3, b3)
    assert jnp.allclose(out, ref_f32, atol=5e-2, rtol=5e-2), "mismatch vs f32 ref"

    # Also exercise a larger, non-tile-multiple batch (multi-step grid +
    # partial final block).
    x2 = jax.random.normal(k1, (300, n_observations), jnp.float32)
    out2 = dqn_forward(x2, *params)
    jax.block_until_ready(out2)
    assert out2.shape == (300, n_actions)
    ref2 = dqn_reference_bf16(x2, w1, b1, w2, b2, w3, b3)
    assert jnp.allclose(out2, ref2, atol=1e-3, rtol=1e-3), "mismatch on batched path"

    print("KERNEL_OK")
</pallas_src>

<mosaic_0001>
module attributes {stable_mosaic.version = 11 : i64} {
  func.func @_dqn_kernel(%arg0: i32, %arg1: memref<8x8xf32, #tpu.memory_space<vmem>>, %arg2: memref<8x128xbf16, #tpu.memory_space<vmem>>, %arg3: memref<1x128xf32, #tpu.memory_space<vmem>>, %arg4: memref<128x128xbf16, #tpu.memory_space<vmem>>, %arg5: memref<1x128xf32, #tpu.memory_space<vmem>>, %arg6: memref<128x4xbf16, #tpu.memory_space<vmem>>, %arg7: memref<1x4xf32, #tpu.memory_space<vmem>>, %arg8: memref<8x4xf32, #tpu.memory_space<vmem>>) attributes {dimension_semantics = [#tpu.dimension_semantics<parallel>], iteration_bounds = array<i64: 1>, scalar_prefetch = 0 : i64, scratch_operands = 0 : i64, tpu.core_type = #tpu.core_type<tc>, window_params = [{transform_indices = @transform_0, window_bounds = array<i64: 8, 8>}, {pipeline_mode = #tpu.pipeline_mode<synchronous>, transform_indices = @transform_1, window_bounds = array<i64: 8, 128>}, {pipeline_mode = #tpu.pipeline_mode<synchronous>, transform_indices = @transform_2, window_bounds = array<i64: 1, 128>}, {pipeline_mode = #tpu.pipeline_mode<synchronous>, transform_indices = @transform_3, window_bounds = array<i64: 128, 128>}, {pipeline_mode = #tpu.pipeline_mode<synchronous>, transform_indices = @transform_4, window_bounds = array<i64: 1, 128>}, {pipeline_mode = #tpu.pipeline_mode<synchronous>, transform_indices = @transform_5, window_bounds = array<i64: 128, 4>}, {pipeline_mode = #tpu.pipeline_mode<synchronous>, transform_indices = @transform_6, window_bounds = array<i64: 1, 4>}, {transform_indices = @transform_7, window_bounds = array<i64: 8, 4>}]} {
    %c0 = arith.constant 0 : index
    %c0_0 = arith.constant 0 : index
    %0 = vector.load %arg1[%c0, %c0_0] : memref<8x8xf32, #tpu.memory_space<vmem>>, vector<8x8xf32>
    %1 = arith.truncf %0 : vector<8x8xf32> to vector<8x8xbf16>
    %c0_1 = arith.constant 0 : index
    %c0_2 = arith.constant 0 : index
    %2 = vector.load %arg2[%c0_1, %c0_2] : memref<8x128xbf16, #tpu.memory_space<vmem>>, vector<8x128xbf16>
    %cst = arith.constant dense<0.000000e+00> : vector<8x128xf32>
    %3 = tpu.matmul %1, %2, %cst {dimension_numbers = #tpu.dot_dimension_numbers<[1], [0], [0], [1], [0, 0, 1, 1], [], []>} : vector<8x8xbf16>, vector<8x128xbf16>, vector<8x128xf32> -> vector<8x128xf32>
    %c0_3 = arith.constant 0 : index
    %c0_4 = arith.constant 0 : index
    %4 = vector.load %arg3[%c0_3, %c0_4] : memref<1x128xf32, #tpu.memory_space<vmem>>, vector<1x128xf32>
    %5 = vector.broadcast %4 : vector<1x128xf32> to vector<8x128xf32>
    %6 = arith.addf %3, %5 : vector<8x128xf32>
    %cst_5 = arith.constant 0.000000e+00 : f32
    %7 = vector.broadcast %cst_5 : f32 to vector<8x128xf32>
    %8 = arith.maximumf %6, %7 : vector<8x128xf32>
    %9 = arith.truncf %8 : vector<8x128xf32> to vector<8x128xbf16>
    %c0_6 = arith.constant 0 : index
    %c0_7 = arith.constant 0 : index
    %10 = vector.load %arg4[%c0_6, %c0_7] : memref<128x128xbf16, #tpu.memory_space<vmem>>, vector<128x128xbf16>
    %cst_8 = arith.constant dense<0.000000e+00> : vector<8x128xf32>
    %11 = tpu.matmul %9, %10, %cst_8 {dimension_numbers = #tpu.dot_dimension_numbers<[1], [0], [0], [1], [0, 0, 1, 1], [], []>} : vector<8x128xbf16>, vector<128x128xbf16>, vector<8x128xf32> -> vector<8x128xf32>
    %c0_9 = arith.constant 0 : index
    %c0_10 = arith.constant 0 : index
    %12 = vector.load %arg5[%c0_9, %c0_10] : memref<1x128xf32, #tpu.memory_space<vmem>>, vector<1x128xf32>
    %13 = vector.broadcast %12 : vector<1x128xf32> to vector<8x128xf32>
    %14 = arith.addf %11, %13 : vector<8x128xf32>
    %cst_11 = arith.constant 0.000000e+00 : f32
    %15 = vector.broadcast %cst_11 : f32 to vector<8x128xf32>
    %16 = arith.maximumf %14, %15 : vector<8x128xf32>
    %17 = arith.truncf %16 : vector<8x128xf32> to vector<8x128xbf16>
    %c0_12 = arith.constant 0 : index
    %c0_13 = arith.constant 0 : index
    %18 = vector.load %arg6[%c0_12, %c0_13] : memref<128x4xbf16, #tpu.memory_space<vmem>>, vector<128x4xbf16>
    %cst_14 = arith.constant dense<0.000000e+00> : vector<8x4xf32>
    %19 = tpu.matmul %17, %18, %cst_14 {dimension_numbers = #tpu.dot_dimension_numbers<[1], [0], [0], [1], [0, 0, 1, 1], [], []>} : vector<8x128xbf16>, vector<128x4xbf16>, vector<8x4xf32> -> vector<8x4xf32>
    %c0_15 = arith.constant 0 : index
    %c0_16 = arith.constant 0 : index
    %20 = vector.load %arg7[%c0_15, %c0_16] : memref<1x4xf32, #tpu.memory_space<vmem>>, vector<1x4xf32>
    %21 = vector.broadcast %20 : vector<1x4xf32> to vector<8x4xf32>
    %22 = arith.addf %19, %21 : vector<8x4xf32>
    %c0_17 = arith.constant 0 : index
    %c0_18 = arith.constant 0 : index
    %23 = vector.load %arg8[%c0_17, %c0_18] : memref<8x4xf32, #tpu.memory_space<vmem>>, vector<8x4xf32>
    tpu.vector_store %arg8[%c0_17, %c0_18], %22 {strides = array<i32>} : memref<8x4xf32, #tpu.memory_space<vmem>>, vector<8x4xf32>,
    return
  }
  func.func @transform_0(%arg0: i32) -> (i32, i32) {
    %c0_i32 = arith.constant 0 : i32
    %c0_i32_0 = arith.constant 0 : i32
    return %arg0, %c0_i32 : i32, i32
  }
  func.func @transform_1(%arg0: i32) -> (i32, i32) {
    %c0_i32 = arith.constant 0 : i32
    %c0_i32_0 = arith.constant 0 : i32
    %c0_i32_1 = arith.constant 0 : i32
    return %c0_i32, %c0_i32_0 : i32, i32
  }
  func.func @transform_2(%arg0: i32) -> (i32, i32) {
    %c0_i32 = arith.constant 0 : i32
    %c0_i32_0 = arith.constant 0 : i32
    %c0_i32_1 = arith.constant 0 : i32
    return %c0_i32, %c0_i32_0 : i32, i32
  }
  func.func @transform_3(%arg0: i32) -> (i32, i32) {
    %c0_i32 = arith.constant 0 : i32
    %c0_i32_0 = arith.constant 0 : i32
    %c0_i32_1 = arith.constant 0 : i32
    return %c0_i32, %c0_i32_0 : i32, i32
  }
  func.func @transform_4(%arg0: i32) -> (i32, i32) {
    %c0_i32 = arith.constant 0 : i32
    %c0_i32_0 = arith.constant 0 : i32
    %c0_i32_1 = arith.constant 0 : i32
    return %c0_i32, %c0_i32_0 : i32, i32
  }
  func.func @transform_5(%arg0: i32) -> (i32, i32) {
    %c0_i32 = arith.constant 0 : i32
    %c0_i32_0 = arith.constant 0 : i32
    %c0_i32_1 = arith.constant 0 : i32
    return %c0_i32, %c0_i32_0 : i32, i32
  }
  func.func @transform_6(%arg0: i32) -> (i32, i32) {
    %c0_i32 = arith.constant 0 : i32
    %c0_i32_0 = arith.constant 0 : i32
    %c0_i32_1 = arith.constant 0 : i32
    return %c0_i32, %c0_i32_0 : i32, i32
  }
  func.func @transform_7(%arg0: i32) -> (i32, i32) {
    %c0_i32 = arith.constant 0 : i32
    %c0_i32_0 = arith.constant 0 : i32
    return %arg0, %c0_i32 : i32, i32
  }
}

</mosaic_0001>

<bundles_post_ra>
// kernel: dqn_forward.1
= control target key start
LH: loop header
LB: loop body
LE: loop exit
PB: predicated region body
PF: predicated region fallthrough
CT: control target
= control target key end

     0   :  { %12 = vsyncpa [#allocation3], 0  ;;  %s630_s0 = inlined_call_operand.vmem [shape: f32[2,8], index: 0, kind: input, shape index: {}]   ;;  %s631_s1 = inlined_call_operand.vmem [shape: bf16[8,128], index: 1, kind: input, shape index: {}]   ;;  %s632_s2 = inlined_call_operand.vmem [shape: f32[1,128], index: 2, kind: input, shape index: {}]   ;;  %s633_s3 = inlined_call_operand.vmem [shape: bf16[128,128], index: 3, kind: input, shape index: {}]   ;;  %s634_s4 = inlined_call_operand.hbm [shape: f32[1,128], index: 4, kind: input, shape index: {}]   ;;  %s635_s5 = inlined_call_operand.vmem [shape: bf16[128,4], index: 5, kind: input, shape index: {}]   ;;  %s636_s6 = inlined_call_operand.vmem [shape: f32[1,4], index: 6, kind: input, shape index: {}]   ;;  %s637_s7 = inlined_call_operand.hbm [shape: f32[2,4], index: 7, kind: output, shape index: {}]  }
   0x1   :  { %13 = vsyncpa [#allocation4], 0  ;;  %s495_s24 = smov [#allocation2]  }
   0x2   :  { %s28_s25 = sshll.u32 %s495_s24, 4  ;;  %s29_s25 = int_to_ptr.vmem [resolvable:$true] %s28_s25 }
   0x3   :  { %s459_s26 = scalar_lea.vmem %s29_s25, 16  ;;  %s463_s27 = scalar_lea.vmem %s29_s25, 32 }
   0x4   :  { %p460_p0 = scmp.ne.s32.totalorder %s29_s25, %s459_s26  ;;  %p464_p1 = scmp.lt.s32.totalorder %s29_s25, %s29_s25 }
   0x5   :  { %p465_p2 = scmp.lt.s32.totalorder %s463_s27, %s459_s26 }
   0x7   :  { %p466_p3 = por %p465_p2, %p464_p1 }
   0x9   :  { %p467_p4 = pnand %p466_p3, %p460_p0 }
   0xb   :  { %470 = shalt.err (!%p467_p4)
}
   0xc   :  { %31 = dma.hbm_to_vmem [thread:$0]  %s634_s4, 16, %s29_s25, [#allocation3]  }
   0xd   :  { %491 = dma.done.wait [#allocation3], 16  }
   0xe   :  { %492 = vsyncadd [#allocation3], 4294967280  ;;  %v496_v0 = vmov 0.0   ;;  %vm497_vm0 = vmmov 0   ;;  %vm54_vm1 = vcmask 1043456   ;;  %v40_v2 = vld [vmem:[%s630_s0] sm:$0xff] }
   0xf   :  { %383 = vmatprep.subr.bf16.mxu0 %v496_v0  ;;  %385 = vmatprep.mubr.msk.bf16.mxu0 %vm497_vm0, %v496_v0  ;;  %v42_v1 = vld [vmem:[%s631_s1] sm:$0xf]  ;;  %v41_v4 = vpack.c.bf16 %v40_v2, %v40_v2  ;;  %v435_v5 = vld [vmem:[%s633_s3 + $0x38] sm:$0xff]   ;;  %vm50_vm2 = vcmask 64512   ;;  %v436_v6 = vld [vmem:[%s633_s3 + $0x30] sm:$0xff]   ;;  %vm324_vm3 = vcmask 31744  }
  0x10   :  { %389 = vmatprep.subr.bf16.mxu1 %v496_v0  ;;  %405 = vmatprep.mubr.msk.bf16.mxu1 %vm497_vm0, %v496_v0  ;;  %v56_v3 = vsel %vm54_vm1, %v42_v1, 0  ;;  %v437_v7 = vld [vmem:[%s633_s3 + $0x28] sm:$0xff]   ;;  %v438_v8 = vld [vmem:[%s633_s3 + $0x20] sm:$0xff]   ;;  %v439_v9 = vld [vmem:[%s633_s3 + $0x18] sm:$0xff]  }
  0x11   :  { %384 = vmatpush3.bf16.msra.mxu0 %v56_v3  ;;  %390 = vmatpush3.bf16.msra.mxu1 %v435_v5  ;;  %v440_v10 = vld [vmem:[%s633_s3 + $0x10] sm:$0xff]   ;;  %v441_v11 = vld [vmem:[%s633_s3 + $0x8] sm:$0xff]   ;;  %v442_v12 = vld [vmem:[%s633_s3] sm:$0xff]  }
  0x12   :  { %409 = vmatprep.subr.bf16.mxu0 %v496_v0  ;;  %391 = vmatprep.subr.bf16.mxu1 %v496_v0  ;;  %v443_v13 = vld [vmem:[%s635_s5 + $0x38] sm:$0xff]   ;;  %v444_v14 = vld [vmem:[%s635_s5 + $0x30] sm:$0xff]   ;;  %v445_v15 = vld [vmem:[%s635_s5 + $0x28] sm:$0xff]  }
  0x13   :  { %v446_v16 = vld [vmem:[%s635_s5 + $0x20] sm:$0xff]   ;;  %v447_v17 = vld [vmem:[%s635_s5 + $0x18] sm:$0xff]   ;;  %v448_v18 = vld [vmem:[%s635_s5 + $0x10] sm:$0xff]  }
  0x14   :  { %386 = vmatmul.mubr.msk.bf16.vlgmr.msra.gmra.mxu0 %vm50_vm2, %v41_v4  ;;  %v343_v19 = vld [vmem:[%s632_s2] ss:$0 sm:$0xff]  ;;  %v449_v27 = vld [vmem:[%s635_s5 + $0x8] sm:$0xff]  }
  0x15   :  { %425 = vmatprep.mubr.msk.bf16.mxu0 %vm497_vm0, %v496_v0  ;;  %392 = vmatpush3.bf16.msra.mxu1 %v436_v6  ;;  %v450_v28 = vld [vmem:[%s635_s5] sm:$0xff]  }
  0x16   :  { %393 = vmatprep.subr.bf16.mxu1 %v496_v0  ;;  %410 = vmatpush3.bf16.msra.mxu0 %v443_v13  ;;  %v345_v29 = vld [vmem:[#allocation2] ss:$0 sm:$0xff] }
  0x17   :  { %411 = vmatprep.subr.bf16.mxu0 %v496_v0  ;;  %v354_v37 = vld [vmem:[%s636_s6] ss:$0 sm:$0xff] }
  0x19   :  { %394 = vmatpush3.bf16.msra.mxu1 %v437_v7 }
  0x1a   :  { %395 = vmatprep.subr.bf16.mxu1 %v496_v0  ;;  %412 = vmatpush3.bf16.msra.mxu0 %v444_v14 }
  0x1b   :  { %413 = vmatprep.subr.bf16.mxu0 %v496_v0 }
  0x1d   :  { %396 = vmatpush3.bf16.msra.mxu1 %v438_v8 }
  0x1e   :  { %397 = vmatprep.subr.bf16.mxu1 %v496_v0  ;;  %414 = vmatpush3.bf16.msra.mxu0 %v445_v15 }
  0x1f   :  { %415 = vmatprep.subr.bf16.mxu0 %v496_v0 }
  0x21   :  { %398 = vmatpush3.bf16.msra.mxu1 %v439_v9 }
  0x22   :  { %399 = vmatprep.subr.bf16.mxu1 %v496_v0  ;;  %416 = vmatpush3.bf16.msra.mxu0 %v446_v16 }
  0x23   :  { %417 = vmatprep.subr.bf16.mxu0 %v496_v0 }
  0x25   :  { %400 = vmatpush3.bf16.msra.mxu1 %v440_v10 }
  0x26   :  { %401 = vmatprep.subr.bf16.mxu1 %v496_v0  ;;  %418 = vmatpush3.bf16.msra.mxu0 %v447_v17 }
  0x27   :  { %419 = vmatprep.subr.bf16.mxu0 %v496_v0 }
  0x29   :  { %402 = vmatpush3.bf16.msra.mxu1 %v441_v11 }
  0x2a   :  { %403 = vmatprep.subr.bf16.mxu1 %v496_v0  ;;  %420 = vmatpush3.bf16.msra.mxu0 %v448_v18 }
  0x2b   :  { %421 = vmatprep.subr.bf16.mxu0 %v496_v0 }
  0x2d   :  { %404 = vmatpush3.bf16.msra.mxu1 %v442_v12 }
  0x2e   :  { %422 = vmatpush3.bf16.msra.mxu0 %v449_v27 }
  0x2f   :  { %423 = vmatprep.subr.bf16.mxu0 %v496_v0 }
  0x32   :  { %424 = vmatpush3.bf16.msra.mxu0 %v450_v28 }
  0xd4   :  { %v92_v20 = vpop.f32.mrf.mxu0 }
  0xd5   :  { %v93_v21 = vadd.f32 %v343_v19, %v92_v20 }
  0xd6   :  { %v387_v22 = vpop.f32.mrf.mxu0 }
  0xd7   :  { %v98_v23 = vmax.f32 %v93_v21, 0.0 }
  0xd8   :  { %v95_v24 = vpop.f32.mrf.mxu0 }
  0xd9   :  { %v99_v25 = vpack.c.bf16 %v98_v23, %v98_v23 }
  0xda   :  { %v388_v26 = vpop.f32.mrf.mxu0 }
  0xdb   :  { %406 = vmatmul.mubr.bf16.vlgmr.msra.gmra.mxu1 %v99_v25 }
 0x19b   :  { %v205_v30 = vpop.f32.mrf.mxu1 }
 0x19c   :  { %v206_v31 = vadd.f32 %v345_v29, %v205_v30 }
 0x19d   :  { %v407_v32 = vpop.f32.mrf.mxu1 }
 0x19e   :  { %v211_v33 = vmax.f32 %v206_v31, 0.0 }
 0x19f   :  { %v208_v34 = vpop.f32.mrf.mxu1 }
 0x1a0   :  { %v212_v35 = vpack.c.bf16 %v211_v33, %v211_v33 }
 0x1a1   :  { %v408_v36 = vpop.f32.mrf.mxu1 }
 0x1a2   :  { %426 = vmatmul.mubr.bf16.vlgmr.msra.gmra.mxu0 %v212_v35 }
 0x262   :  { %v318_v38 = vpop.f32.mrf.mxu0 }
 0x263   :  { %v319_v39 = vadd.f32 %v354_v37, %v318_v38 }
 0x264   :  { %v427_v40 = vpop.f32.mrf.mxu0 }
 0x265   :  { %325 = vst.msk [vmem:[#allocation5] sm:$0xff] %vm324_vm3, %v319_v39 }
 0x266   :  { %v321_v41 = vpop.f32.mrf.mxu0 }
 0x268   :  { %v428_v42 = vpop.f32.mrf.mxu0 }
 0x269   :  { %330 = vsyncadd [#allocation4], 96  ;;  %s498_s5 = smov [#allocation5]  }
 0x26a   :  { %s331_s16 = sshll.u32 %s498_s5, 4  ;;  %s332_s16 = int_to_ptr.vmem [resolvable:$true] %s331_s16 }
 0x26b   :  { %s471_s17 = scalar_lea.vmem %s332_s16, 32  ;;  %s475_s18 = scalar_lea.vmem %s332_s16, 128 }
 0x26c   :  { %p472_p5 = scmp.ne.s32.totalorder %s332_s16, %s471_s17  ;;  %p476_p6 = scmp.lt.s32.totalorder %s332_s16, %s332_s16 }
 0x26d   :  { %p477_p7 = scmp.lt.s32.totalorder %s475_s18, %s471_s17 }
 0x26f   :  { %p478_p8 = por %p477_p7, %p476_p6 }
 0x271   :  { %p479_p9 = pnand %p478_p8, %p472_p5 }
 0x273   :  { %482 = shalt.err (!%p479_p9)
}
 0x274   :  { %s499_s6 = smov 32   ;;  %s500_s19 = smov 2  }
 0x275   :  { %337 = dma.vmem_to_hbm [thread:$0]  %s332_s16, 32, %s637_s7, [#allocation4], %s499_s6, %s499_s6, %s500_s19  }
 0x276   :  { %493 = dma.done.wait [#allocation4], 128  }
 0x277   :  { %494 = vsyncadd [#allocation4], 4294967168 }
 0x278   :  { %341 = vsyncpa [#allocation3], 1 }
 0x279   :  { %342 = vsyncpa [#allocation4], 1 }

</bundles_post_ra>
